<compile_context>
chip_gen: v7x
topology: tpu7x:2x2x1
jax: 0.10.0
libtpu: 0.0.40
codegen_flags: <defaults>
</compile_context>

<pallas_src>
import functools

import jax
import jax.numpy as jnp
from jax.experimental import pallas as pl
from jax.experimental.pallas import tpu as pltpu


def _round_up(x: int, m: int) -> int:
    return ((x + m - 1) // m) * m


def _rgcn_self_loop_kernel(h_ref, w_ref, b_ref, o_ref):
    # h_ref: (TM, F) streaming tile     w_ref: (F, F) resident, already in MXU dtype
    # b_ref: (1, F) resident f32        o_ref: (TM, F)
    h = h_ref[...]
    # Self-loop message on the MXU, f32 accumulation.  Weight is pre-cast in the
    # wrapper, so the only per-tile cast is the streaming h tile.
    loop_msg = jnp.dot(
        h.astype(w_ref.dtype), w_ref[...], preferred_element_type=jnp.float32
    )
    # node_repr = loop_message + h + bias, then relu.  Epilogue adds in f32.
    node = loop_msg + h.astype(jnp.float32) + b_ref[...]
    o_ref[...] = jnp.maximum(node, 0.0).astype(o_ref.dtype)


@functools.partial(jax.jit, static_argnames=("tm", "mxu_bf16"))
def rgcn_layer_forward(h, loop_weight, bias, *, tm=1024, mxu_bf16=True):
    """Returns the updated node representation g.ndata['h'].

    h:           (N, F) node features (f32 or bf16; output matches h.dtype)
    loop_weight: (F, F) self-loop weight
    bias:        (F,)   bias
    """
    N, F = h.shape
    assert loop_weight.shape == (F, F)
    assert bias.shape == (F,)

    # --- row-tile selection ---------------------------------------------------
    # Multiple of 8 (sublane), no larger than N rounded to 8.  Rebalance so every
    # grid step carries roughly the same number of valid rows (keeps the two v7x
    # TensorCores evenly loaded when the "parallel" axis is split).
    tm_eff = max(8, min(tm, _round_up(N, 8)))
    num_tiles = pl.cdiv(N, tm_eff)
    tm_eff = _round_up(pl.cdiv(N, num_tiles), 8)
    num_tiles = pl.cdiv(N, tm_eff)
    grid = (num_tiles,)

    # --- dtype handling ---------------------------------------------------------
    mxu_dtype = jnp.bfloat16 if mxu_bf16 else jnp.float32
    w_mxu = loop_weight.astype(mxu_dtype)          # hoisted cast, done once per call
    bias2d = bias.astype(jnp.float32).reshape(1, F)

    # --- VMEM budget / compiler params -----------------------------------------
    in_item = jnp.dtype(h.dtype).itemsize
    w_item = jnp.dtype(mxu_dtype).itemsize
    vmem_needed = (
        2 * tm_eff * F * in_item       # streaming h tiles (double-buffered)
        + 2 * tm_eff * F * in_item     # streaming out tiles (double-buffered)
        + F * F * w_item               # resident weight, single buffer
        + F * 4                        # resident f32 bias
    )
    try:
        phys_vmem = int(pltpu.get_tpu_info().vmem_capacity_bytes)
    except Exception:
        phys_vmem = 64 << 20           # conservative fallback (v7x-sized)
    vmem_cap = max(32 << 20, (phys_vmem * 3) // 4)   # 48 MiB v7x, 96 MiB v5e/v6e
    vmem_limit = int(min(max(2 * vmem_needed, 32 << 20), vmem_cap))

    cost = pl.CostEstimate(
        flops=2 * N * F * F,
        transcendentals=0,
        bytes_accessed=2 * N * F * in_item + F * F * w_item + F * 4,
    )

    return pl.pallas_call(
        _rgcn_self_loop_kernel,
        out_shape=jax.ShapeDtypeStruct((N, F), h.dtype),
        grid_spec=pltpu.PrefetchScalarGridSpec(
            num_scalar_prefetch=0,
            grid=grid,
            in_specs=[
                # streaming h tile (double-buffered by default); ragged last block OK
                pl.BlockSpec((tm_eff, F), lambda i: (i, 0)),
                # resident weight: same block every step -> single-buffer it
                pl.BlockSpec((F, F), lambda i: (0, 0),
                             pipeline_mode=pl.Buffered(1)),
                # resident bias
                pl.BlockSpec((1, F), lambda i: (0, 0),
                             pipeline_mode=pl.Buffered(1)),
            ],
            out_specs=pl.BlockSpec((tm_eff, F), lambda i: (i, 0)),
        ),
        compiler_params=pltpu.CompilerParams(
            dimension_semantics=("parallel",),
            vmem_limit_bytes=vmem_limit,
        ),
        cost_estimate=cost,
    )(h, w_mxu, bias2d)


# TODO(synk): `propagate` (relation-specific message passing over the graph) is
# abstract (raises NotImplementedError) in this base class, so the returned
# `weight_` / rel_activation / rel_dropout paths are not translated here.
# TODO(synk): nn.Dropout is identity at inference; train-mode dropout on the
# self-loop message is not implemented in-kernel.
# TODO(synk): for very large hidden sizes (resident (F,F) weight past ~2.8k f32 /
# ~4k bf16 on v7x, ~4k f32 / ~5.7k bf16 on v5e/v6e) tile the output-feature axis
# (TN multiple of 256 on v6e/v7x, 128 on v5e) and/or the contraction axis with an
# f32 accumulator scratch + pl.when init/finalize, keeping that axis last and
# marked "arbitrary".


def _reference_forward(h, loop_weight, bias):
    loop_message = h @ loop_weight
    node_repr = h + bias[None, :] + loop_message
    return jnp.maximum(node_repr, 0.0)


if __name__ == "__main__":
    # Small shapes consistent with the module: self_loop + bias requires a square
    # loop_weight for the residual add, so in_feat == out_feat.  N deliberately
    # not tile-divisible to exercise the ragged last block.
    N = 200          # number of graph nodes
    F = 128          # in_feat == out_feat (hidden size)

    key = jax.random.PRNGKey(0)
    k_h, k_w, k_b = jax.random.split(key, 3)

    h = jax.random.normal(k_h, (N, F), dtype=jnp.float32)

    # Deterministic Xavier-uniform init with relu gain (as in the module).
    gain = float(jnp.sqrt(2.0))  # nn.init.calculate_gain('relu')
    limit_w = gain * (6.0 / (F + F)) ** 0.5
    loop_weight = jax.random.uniform(
        k_w, (F, F), dtype=jnp.float32, minval=-limit_w, maxval=limit_w
    )
    limit_b = gain * (6.0 / (1 + F)) ** 0.5
    bias = jax.random.uniform(
        k_b, (F,), dtype=jnp.float32, minval=-limit_b, maxval=limit_b
    )

    ref = _reference_forward(h, loop_weight, bias)

    # Default path: bf16 MXU weights, f32 accumulate + f32 epilogue, no pad/slice.
    out = jax.block_until_ready(rgcn_layer_forward(h, loop_weight, bias))
    assert out.shape == (N, F) and out.dtype == h.dtype
    assert jnp.allclose(out, ref, atol=5e-2, rtol=5e-2), "bf16-MXU path mismatch"

    # Exact-f32 path matches the reference tightly.
    out_f32 = jax.block_until_ready(
        rgcn_layer_forward(h, loop_weight, bias, mxu_bf16=False)
    )
    assert jnp.allclose(out_f32, ref, atol=1e-4, rtol=1e-4), "f32 path mismatch"

    # Multi-tile ragged path: grid of 4 balanced ~250-row tiles at tm=256.
    N2 = 1000
    h2 = jax.random.normal(jax.random.PRNGKey(1), (N2, F), dtype=jnp.float32)
    out2 = jax.block_until_ready(rgcn_layer_forward(h2, loop_weight, bias, tm=256))
    ref2 = _reference_forward(h2, loop_weight, bias)
    assert out2.shape == (N2, F)
    assert jnp.allclose(out2, ref2, atol=5e-2, rtol=5e-2), "multi-tile mismatch"

    # bf16-streaming path: caller holds h in bf16 -> half the HBM read/write traffic.
    h_bf16 = h.astype(jnp.bfloat16)
    out_bf = jax.block_until_ready(rgcn_layer_forward(h_bf16, loop_weight, bias))
    assert out_bf.shape == (N, F) and out_bf.dtype == jnp.bfloat16
    assert jnp.allclose(out_bf.astype(jnp.float32), ref, atol=1e-1, rtol=1e-1), \
        "bf16-streaming path mismatch"

    print("KERNEL_OK")
</pallas_src>

<mosaic_0001>
module attributes {stable_mosaic.version = 11 : i64} {
  func.func @_rgcn_self_loop_kernel(%arg0: i32, %arg1: memref<200x128xf32, #tpu.memory_space<vmem>>, %arg2: memref<128x128xbf16, #tpu.memory_space<vmem>>, %arg3: memref<1x128xf32, #tpu.memory_space<vmem>>, %arg4: memref<200x128xf32, #tpu.memory_space<vmem>>) attributes {dimension_semantics = [#tpu.dimension_semantics<parallel>], iteration_bounds = array<i64: 1>, scalar_prefetch = 0 : i64, scratch_operands = 0 : i64, tpu.core_type = #tpu.core_type<tc>, window_params = [{transform_indices = @transform_0, window_bounds = array<i64: 200, 128>}, {pipeline_mode = #tpu.pipeline_mode<synchronous>, transform_indices = @transform_1, window_bounds = array<i64: 128, 128>}, {pipeline_mode = #tpu.pipeline_mode<synchronous>, transform_indices = @transform_2, window_bounds = array<i64: 1, 128>}, {transform_indices = @transform_3, window_bounds = array<i64: 200, 128>}]} {
    %c0 = arith.constant 0 : index
    %c0_0 = arith.constant 0 : index
    %0 = vector.load %arg1[%c0, %c0_0] : memref<200x128xf32, #tpu.memory_space<vmem>>, vector<200x128xf32>
    %1 = arith.truncf %0 : vector<200x128xf32> to vector<200x128xbf16>
    %c0_1 = arith.constant 0 : index
    %c0_2 = arith.constant 0 : index
    %2 = vector.load %arg2[%c0_1, %c0_2] : memref<128x128xbf16, #tpu.memory_space<vmem>>, vector<128x128xbf16>
    %cst = arith.constant dense<0.000000e+00> : vector<200x128xf32>
    %3 = tpu.matmul %1, %2, %cst {dimension_numbers = #tpu.dot_dimension_numbers<[1], [0], [0], [1], [0, 0, 1, 1], [], []>} : vector<200x128xbf16>, vector<128x128xbf16>, vector<200x128xf32> -> vector<200x128xf32>
    %4 = arith.addf %3, %0 : vector<200x128xf32>
    %c0_3 = arith.constant 0 : index
    %c0_4 = arith.constant 0 : index
    %5 = vector.load %arg3[%c0_3, %c0_4] : memref<1x128xf32, #tpu.memory_space<vmem>>, vector<1x128xf32>
    %6 = vector.broadcast %5 : vector<1x128xf32> to vector<200x128xf32>
    %7 = arith.addf %4, %6 : vector<200x128xf32>
    %cst_5 = arith.constant 0.000000e+00 : f32
    %8 = vector.broadcast %cst_5 : f32 to vector<200x128xf32>
    %9 = arith.maximumf %7, %8 : vector<200x128xf32>
    %c0_6 = arith.constant 0 : index
    %c0_7 = arith.constant 0 : index
    %10 = vector.load %arg4[%c0_6, %c0_7] : memref<200x128xf32, #tpu.memory_space<vmem>>, vector<200x128xf32>
    tpu.vector_store %arg4[%c0_6, %c0_7], %9 {strides = array<i32>} : memref<200x128xf32, #tpu.memory_space<vmem>>, vector<200x128xf32>,
    return
  }
  func.func @transform_0(%arg0: i32) -> (i32, i32) {
    %c0_i32 = arith.constant 0 : i32
    %c0_i32_0 = arith.constant 0 : i32
    return %arg0, %c0_i32 : i32, i32
  }
  func.func @transform_1(%arg0: i32) -> (i32, i32) {
    %c0_i32 = arith.constant 0 : i32
    %c0_i32_0 = arith.constant 0 : i32
    %c0_i32_1 = arith.constant 0 : i32
    return %c0_i32, %c0_i32_0 : i32, i32
  }
  func.func @transform_2(%arg0: i32) -> (i32, i32) {
    %c0_i32 = arith.constant 0 : i32
    %c0_i32_0 = arith.constant 0 : i32
    %c0_i32_1 = arith.constant 0 : i32
    return %c0_i32, %c0_i32_0 : i32, i32
  }
  func.func @transform_3(%arg0: i32) -> (i32, i32) {
    %c0_i32 = arith.constant 0 : i32
    %c0_i32_0 = arith.constant 0 : i32
    return %arg0, %c0_i32 : i32, i32
  }
}

</mosaic_0001>

<bundles_post_ra>
// kernel: rgcn_layer_forward.1
= control target key start
LH: loop header
LB: loop body
LE: loop exit
PB: predicated region body
PF: predicated region fallthrough
CT: control target
= control target key end

     0   :  { %8 = vsyncpa [#allocation3], 0  ;;  %s796_s0 = inlined_call_operand.hbm [shape: f32[200,128], index: 0, kind: input, shape index: {}]   ;;  %s797_s1 = inlined_call_operand.vmem [shape: bf16[128,128], index: 1, kind: input, shape index: {}]   ;;  %s798_s2 = inlined_call_operand.vmem [shape: f32[1,128], index: 2, kind: input, shape index: {}]   ;;  %s799_s3 = inlined_call_operand.hbm [shape: f32[200,128], index: 3, kind: output, shape index: {}]  }
   0x1   :  { %9 = vsyncpa [#allocation4], 0  ;;  %s543_s12 = smov [#allocation2]   ;;  %s495_s16 = scalar_lea.hbm %s796_s0, 3200 }
   0x2   :  { %s15_s13 = sshll.u32 %s543_s12, 4  ;;  %p496_p0 = scmp.ne.s32.totalorder %s796_s0, %s495_s16  ;;  %s16_s13 = int_to_ptr.vmem [resolvable:$true] %s15_s13 }
   0x3   :  { %p499_p1 = scmp.lt.u32.totalorder %s495_s16, %s796_s0 }
   0x5   :  { %p501_p2 = pnand %p499_p1, %p496_p0 }
   0x7   :  { %504 = shalt.err (!%p501_p2)
}
   0x8   :  { %s505_s21 = scalar_lea.vmem %s16_s13, 3200  ;;  %p510_p4 = scmp.lt.s32.totalorder %s16_s13, %s16_s13 }
   0x9   :  { %p506_p3 = scmp.ne.s32.totalorder %s16_s13, %s505_s21  ;;  %p511_p5 = scmp.lt.s32.totalorder %s505_s21, %s505_s21 }
   0xb   :  { %p512_p6 = por %p511_p5, %p510_p4 }
   0xd   :  { %p513_p7 = pnand %p512_p6, %p506_p3 }
   0xf   :  { %516 = shalt.err (!%p513_p7)
}
  0x10   :  { %s544_s22 = smov 128   ;;  %s545_s23 = smov 8  }
  0x11   :  { %21 = dma.hbm_to_vmem [thread:$0]  %s796_s0, 3200, %s16_s13, [#allocation3], %s544_s22, %s544_s22, %s545_s23  }
  0x12   :  { %539 = dma.done.wait [#allocation3], 3200  }
  0x13   :  { %540 = vsyncadd [#allocation3], 4294964096  ;;  %v546_v0 = vmov 0.0   ;;  %vm547_vm0 = vmmov 0   ;;  %v487_v1 = vld [vmem:[%s797_s1] sm:$0xff]   ;;  %v488_v2 = vld [vmem:[%s797_s1 + $0x8] sm:$0xff]  }
  0x14   :  { %397 = vmatprep.subr.bf16.mxu0 %v546_v0  ;;  %465 = vmatprep.subr.bf16.mxu1 %v546_v0  ;;  %v489_v3 = vld [vmem:[%s797_s1 + $0x10] sm:$0xff]   ;;  %v490_v4 = vld [vmem:[%s797_s1 + $0x18] sm:$0xff]   ;;  %v491_v5 = vld [vmem:[%s797_s1 + $0x20] sm:$0xff]  }
  0x15   :  { %413 = vmatprep.mubr.msk.bf16.mxu0 %vm547_vm0, %v546_v0  ;;  %441 = vmatprep.mubr.msk.bf16.mxu1 %vm547_vm0, %v546_v0  ;;  %v492_v6 = vld [vmem:[%s797_s1 + $0x28] sm:$0xff]   ;;  %v493_v7 = vld [vmem:[%s797_s1 + $0x30] sm:$0xff]   ;;  %v494_v8 = vld [vmem:[%s797_s1 + $0x38] sm:$0xff]  }
  0x16   :  { %398 = vmatpush3.bf16.msra.mxu0 %v487_v1  ;;  %473 = vmatpush3.bf16.msra.mxu1 %v487_v1  ;;  %v626_v9 = vld [vmem:[#allocation2] sm:$0xff]  ;;  %v628_v10 = vld [vmem:[#allocation2 + $0x8] sm:$0xff]  ;;  %v630_v11 = vld [vmem:[#allocation2 + $0x70] sm:$0xff] }
  0x17   :  { %399 = vmatprep.subr.bf16.mxu0 %v546_v0  ;;  %466 = vmatprep.subr.bf16.mxu1 %v546_v0  ;;  %v632_v12 = vld [vmem:[#allocation2 + $0x78] sm:$0xff]  ;;  %v55_v13 = vpack.c.bf16 %v628_v10, %v626_v9  ;;  %v640_v15 = vld [vmem:[#allocation2 + $0x10] sm:$0xff]  ;;  %v648_v17 = vld [vmem:[#allocation2 + $0x80] sm:$0xff] }
  0x18   :  { %v62_v14 = vpack.c.bf16 %v632_v12, %v630_v11  ;;  %v644_v16 = vld [vmem:[#allocation2 + $0x18] sm:$0xff]  ;;  %v650_v18 = vld [vmem:[#allocation2 + $0x88] sm:$0xff]  ;;  %v656_v21 = vld [vmem:[#allocation2 + $0x20] sm:$0xff] }
  0x19   :  { %v56_v19 = vpack.c.bf16 %v644_v16, %v640_v15  ;;  %v63_v20 = vpack.c.bf16 %v650_v18, %v648_v17  ;;  %v660_v22 = vld [vmem:[#allocation2 + $0x28] sm:$0xff]  ;;  %v664_v23 = vld [vmem:[#allocation2 + $0x90] sm:$0xff]  ;;  %v666_v24 = vld [vmem:[#allocation2 + $0x98] sm:$0xff] }
  0x1a   :  { %400 = vmatpush3.bf16.msra.mxu0 %v488_v2  ;;  %474 = vmatpush3.bf16.msra.mxu1 %v488_v2  ;;  %v57_v25 = vpack.c.bf16 %v660_v22, %v656_v21  ;;  %v64_v26 = vpack.c.bf16 %v666_v24, %v664_v23  ;;  %v672_v27 = vld [vmem:[#allocation2 + $0x30] sm:$0xff]  ;;  %v676_v28 = vld [vmem:[#allocation2 + $0x38] sm:$0xff]  ;;  %v680_v29 = vld [vmem:[#allocation2 + $0xa0] sm:$0xff] }
  0x1b   :  { %401 = vmatprep.subr.bf16.mxu0 %v546_v0  ;;  %467 = vmatprep.subr.bf16.mxu1 %v546_v0  ;;  %v682_v30 = vld [vmem:[#allocation2 + $0xa8] sm:$0xff]  ;;  %v58_v31 = vpack.c.bf16 %v676_v28, %v672_v27  ;;  %v688_v33 = vld [vmem:[#allocation2 + $0x40] sm:$0xff]  ;;  %v696_v35 = vld [vmem:[#allocation2 + $0xb0] sm:$0xff] }
  0x1c   :  { %v65_v32 = vpack.c.bf16 %v682_v30, %v680_v29  ;;  %v692_v34 = vld [vmem:[#allocation2 + $0x48] sm:$0xff]  ;;  %v698_v36 = vld [vmem:[#allocation2 + $0xb8] sm:$0xff]  ;;  %v706_v39 = vld [vmem:[#allocation2 + $0x50] sm:$0xff] }
  0x1d   :  { %v59_v37 = vpack.c.bf16 %v692_v34, %v688_v33  ;;  %v66_v38 = vpack.c.bf16 %v698_v36, %v696_v35  ;;  %v708_v40 = vld [vmem:[#allocation2 + $0x58] sm:$0xff]  ;;  %v712_v41 = vld [vmem:[#allocation2 + $0xc0] sm:$0xff]  ;;  %v722_v45 = vld [vmem:[#allocation2 + $0x68] sm:$0xff] }
  0x1e   :  { %402 = vmatpush3.bf16.msra.mxu0 %v489_v3  ;;  %475 = vmatpush3.bf16.msra.mxu1 %v489_v3  ;;  %v60_v42 = vpack.c.bf16 %v708_v40, %v706_v39  ;;  %v67_v43 = vpack.c.bf16 %v712_v41, %v712_v41  ;;  %v720_v44 = vld [vmem:[#allocation2 + $0x60] sm:$0xff] }
  0x1f   :  { %403 = vmatprep.subr.bf16.mxu0 %v546_v0  ;;  %468 = vmatprep.subr.bf16.mxu1 %v546_v0  ;;  %v61_v46 = vpack.c.bf16 %v722_v45, %v720_v44  ;;  %v729_v48 = vld [vmem:[%s798_s2] ss:$0 sm:$0xff]  ;;  %s548_s2 = smov [#allocation5]  }
  0x20   :  { %s355_s15 = sshll.u32 %s548_s2, 4  ;;  %s356_s15 = int_to_ptr.vmem [resolvable:$true] %s355_s15 }
  0x21   :  { %s517_s16 = scalar_lea.vmem %s356_s15, 3200  ;;  %p522_p9 = scmp.lt.s32.totalorder %s356_s15, %s356_s15 }
  0x22   :  { %404 = vmatpush3.bf16.msra.mxu0 %v490_v4  ;;  %476 = vmatpush3.bf16.msra.mxu1 %v490_v4  ;;  %p518_p8 = scmp.ne.s32.totalorder %s356_s15, %s517_s16  ;;  %p523_p10 = scmp.lt.s32.totalorder %s517_s16, %s517_s16 }
  0x23   :  { %405 = vmatprep.subr.bf16.mxu0 %v546_v0  ;;  %469 = vmatprep.subr.bf16.mxu1 %v546_v0 }
  0x24   :  { %p524_p11 = por %p523_p10, %p522_p9 }
  0x26   :  { %406 = vmatpush3.bf16.msra.mxu0 %v491_v5  ;;  %477 = vmatpush3.bf16.msra.mxu1 %v491_v5  ;;  %p525_p12 = pnand %p524_p11, %p518_p8 }
  0x27   :  { %407 = vmatprep.subr.bf16.mxu0 %v546_v0  ;;  %470 = vmatprep.subr.bf16.mxu1 %v546_v0 }
  0x2a   :  { %408 = vmatpush3.bf16.msra.mxu0 %v492_v6  ;;  %478 = vmatpush3.bf16.msra.mxu1 %v492_v6 }
  0x2b   :  { %409 = vmatprep.subr.bf16.mxu0 %v546_v0  ;;  %471 = vmatprep.subr.bf16.mxu1 %v546_v0 }
  0x2e   :  { %410 = vmatpush3.bf16.msra.mxu0 %v493_v7  ;;  %479 = vmatpush3.bf16.msra.mxu1 %v493_v7 }
  0x2f   :  { %411 = vmatprep.subr.bf16.mxu0 %v546_v0  ;;  %472 = vmatprep.subr.bf16.mxu1 %v546_v0 }
  0x32   :  { %412 = vmatpush3.bf16.msra.mxu0 %v494_v8  ;;  %480 = vmatpush3.bf16.msra.mxu1 %v494_v8 }
  0x35   :  { %414 = vmatmul.mubr.bf16.vlgmr.msra.gmra.mrb[0].mxu0 %v55_v13  ;;  %442 = vmatmul.mubr.bf16.vlgmr.msra.gmra.mrb[0].mxu1 %v62_v14 }
  0x36   :  { %417 = vmatprep.mubr.msk.bf16.mxu0 %vm547_vm0, %v546_v0  ;;  %445 = vmatprep.mubr.msk.bf16.mxu1 %vm547_vm0, %v546_v0 }
  0x3d   :  { %418 = vmatmul.mubr.bf16.gmra.mrb[4].mxu0 %v56_v19  ;;  %446 = vmatmul.mubr.bf16.gmra.mrb[4].mxu1 %v63_v20 }
  0x3e   :  { %421 = vmatprep.mubr.msk.bf16.mxu0 %vm547_vm0, %v546_v0  ;;  %449 = vmatprep.mubr.msk.bf16.mxu1 %vm547_vm0, %v546_v0 }
  0x45   :  { %422 = vmatmul.mubr.bf16.gmra.mrb[8].mxu0 %v57_v25  ;;  %450 = vmatmul.mubr.bf16.gmra.mrb[8].mxu1 %v64_v26 }
  0x46   :  { %425 = vmatprep.mubr.msk.bf16.mxu0 %vm547_vm0, %v546_v0  ;;  %453 = vmatprep.mubr.msk.bf16.mxu1 %vm547_vm0, %v546_v0 }
  0x4d   :  { %426 = vmatmul.mubr.bf16.gmra.mrb[12].mxu0 %v58_v31  ;;  %454 = vmatmul.mubr.bf16.gmra.mrb[12].mxu1 %v65_v32 }
  0x4e   :  { %429 = vmatprep.mubr.msk.bf16.mxu0 %vm547_vm0, %v546_v0  ;;  %457 = vmatprep.mubr.msk.bf16.mxu1 %vm547_vm0, %v546_v0 }
  0x55   :  { %430 = vmatmul.mubr.bf16.gmra.mrb[16].mxu0 %v59_v37  ;;  %458 = vmatmul.mubr.bf16.gmra.mrb[16].mxu1 %v66_v38 }
  0x56   :  { %433 = vmatprep.mubr.msk.bf16.mxu0 %vm547_vm0, %v546_v0  ;;  %461 = vmatprep.mubr.msk.bf16.mxu1 %vm547_vm0, %v546_v0 }
  0x5d   :  { %434 = vmatmul.mubr.bf16.gmra.mrb[20].mxu0 %v60_v42  ;;  %462 = vmatmul.mubr.bf16.gmra.mrb[20].mxu1 %v67_v43 }
  0x5e   :  { %437 = vmatprep.mubr.msk.bf16.mxu0 %vm547_vm0, %v546_v0 }
  0x65   :  { %438 = vmatmul.mubr.bf16.gmra.mrb[24].mxu0 %v61_v46 }
 0x108   :  { %v166_v47 = vpop.f32.mrb[0].mxu0  ;;  %v222_v49 = vpop.f32.mrb[0].mxu1 }
 0x109   :  { %v167_v50 = vadd.f32 %v166_v47, %v626_v9  ;;  %v415_v51 = vpop.f32.mrb[1].mxu0  ;;  %v223_v52 = vadd.f32 %v222_v49, %v630_v11  ;;  %v443_v53 = vpop.f32.mrb[1].mxu1 }
 0x10a   :  { %v169_v54 = vpop.f32.mrb[2].mxu0  ;;  %v225_v55 = vpop.f32.mrb[2].mxu1 }
 0x10b   :  { %v275_v56 = vadd.f32 %v729_v48, %v167_v50  ;;  %v170_v57 = vadd.f32 %v169_v54, %v628_v10  ;;  %v416_v58 = vpop.f32.mrb[3].mxu0  ;;  %v289_v59 = vadd.f32 %v729_v48, %v223_v52  ;;  %v226_v60 = vadd.f32 %v225_v55, %v632_v12  ;;  %v444_v61 = vpop.f32.mrb[3].mxu1 }
 0x10d   :  { %v300_v62 = vmax.f32 %v275_v56, 0.0  ;;  %v276_v63 = vadd.f32 %v729_v48, %v170_v57  ;;  %v314_v0 = vmax.f32 %v289_v59, 0.0  ;;  %v290_v1 = vadd.f32 %v729_v48, %v226_v60 }
 0x10f   :  { %325 = vst [vmem:[#allocation5] sm:$0xff] %v300_v62  ;;  %v301_v2 = vmax.f32 %v276_v63, 0.0  ;;  %339 = vst [vmem:[#allocation5 + $0x70] sm:$0xff] %v314_v0  ;;  %v315_v3 = vmax.f32 %v290_v1, 0.0 }
 0x110   :  { %v174_v4 = vpop.f32.mrb[4].mxu0  ;;  %v230_v5 = vpop.f32.mrb[4].mxu1 }
 0x111   :  { %326 = vst [vmem:[#allocation5 + $0x8] sm:$0xff] %v301_v2  ;;  %v175_v6 = vadd.f32 %v174_v4, %v640_v15  ;;  %v419_v7 = vpop.f32.mrb[5].mxu0  ;;  %340 = vst [vmem:[#allocation5 + $0x78] sm:$0xff] %v315_v3  ;;  %v231_v8 = vadd.f32 %v230_v5, %v648_v17  ;;  %v447_v9 = vpop.f32.mrb[5].mxu1 }
 0x112   :  { %v177_v10 = vpop.f32.mrb[6].mxu0  ;;  %v233_v11 = vpop.f32.mrb[6].mxu1 }
 0x113   :  { %v277_v12 = vadd.f32 %v729_v48, %v175_v6  ;;  %v178_v13 = vadd.f32 %v177_v10, %v644_v16  ;;  %v420_v14 = vpop.f32.mrb[7].mxu0  ;;  %v291_v19 = vadd.f32 %v729_v48, %v231_v8  ;;  %v234_v20 = vadd.f32 %v233_v11, %v650_v18  ;;  %v448_v25 = vpop.f32.mrb[7].mxu1 }
 0x115   :  { %v302_v26 = vmax.f32 %v277_v12, 0.0  ;;  %v278_v15 = vadd.f32 %v729_v48, %v178_v13  ;;  %v316_v31 = vmax.f32 %v291_v19, 0.0  ;;  %v292_v32 = vadd.f32 %v729_v48, %v234_v20 }
 0x117   :  { %327 = vst [vmem:[#allocation5 + $0x10] sm:$0xff] %v302_v26  ;;  %v303_v17 = vmax.f32 %v278_v15, 0.0  ;;  %341 = vst [vmem:[#allocation5 + $0x80] sm:$0xff] %v316_v31  ;;  %v317_v37 = vmax.f32 %v292_v32, 0.0 }
 0x118   :  { %v182_v38 = vpop.f32.mrb[8].mxu0  ;;  %v238_v42 = vpop.f32.mrb[8].mxu1 }
 0x119   :  { %328 = vst [vmem:[#allocation5 + $0x18] sm:$0xff] %v303_v17  ;;  %v183_v16 = vadd.f32 %v182_v38, %v656_v21  ;;  %v423_v43 = vpop.f32.mrb[9].mxu0  ;;  %342 = vst [vmem:[#allocation5 + $0x88] sm:$0xff] %v317_v37  ;;  %v239_v18 = vadd.f32 %v238_v42, %v664_v23  ;;  %v451_v46 = vpop.f32.mrb[9].mxu1 }
 0x11a   :  { %v185_v47 = vpop.f32.mrb[10].mxu0  ;;  %v241_v49 = vpop.f32.mrb[10].mxu1 }
 0x11b   :  { %v279_v50 = vadd.f32 %v729_v48, %v183_v16  ;;  %v186_v51 = vadd.f32 %v185_v47, %v660_v22  ;;  %v424_v52 = vpop.f32.mrb[11].mxu0  ;;  %v293_v53 = vadd.f32 %v729_v48, %v239_v18  ;;  %v242_v54 = vadd.f32 %v241_v49, %v666_v24  ;;  %v452_v55 = vpop.f32.mrb[11].mxu1 }
 0x11d   :  { %v304_v56 = vmax.f32 %v279_v50, 0.0  ;;  %v280_v21 = vadd.f32 %v729_v48, %v186_v51  ;;  %v318_v57 = vmax.f32 %v293_v53, 0.0  ;;  %v294_v58 = vadd.f32 %v729_v48, %v242_v54 }
 0x11f   :  { %329 = vst [vmem:[#allocation5 + $0x20] sm:$0xff] %v304_v56  ;;  %v305_v23 = vmax.f32 %v280_v21, 0.0  ;;  %343 = vst [vmem:[#allocation5 + $0x90] sm:$0xff] %v318_v57  ;;  %v319_v59 = vmax.f32 %v294_v58, 0.0 }
 0x120   :  { %v190_v60 = vpop.f32.mrb[12].mxu0  ;;  %v246_v61 = vpop.f32.mrb[12].mxu1 }
 0x121   :  { %330 = vst [vmem:[#allocation5 + $0x28] sm:$0xff] %v305_v23  ;;  %v191_v22 = vadd.f32 %v190_v60, %v672_v27  ;;  %v427_v62 = vpop.f32.mrb[13].mxu0  ;;  %344 = vst [vmem:[#allocation5 + $0x98] sm:$0xff] %v319_v59  ;;  %v247_v24 = vadd.f32 %v246_v61, %v680_v29  ;;  %v455_v63 = vpop.f32.mrb[13].mxu1 }
 0x122   :  { %v193_v0 = vpop.f32.mrb[14].mxu0  ;;  %v249_v1 = vpop.f32.mrb[14].mxu1 }
 0x123   :  { %v281_v2 = vadd.f32 %v729_v48, %v191_v22  ;;  %v194_v3 = vadd.f32 %v193_v0, %v676_v28  ;;  %v428_v4 = vpop.f32.mrb[15].mxu0  ;;  %v295_v5 = vadd.f32 %v729_v48, %v247_v24  ;;  %v250_v6 = vadd.f32 %v249_v1, %v682_v30  ;;  %v456_v7 = vpop.f32.mrb[15].mxu1 }
 0x125   :  { %v306_v8 = vmax.f32 %v281_v2, 0.0  ;;  %v282_v27 = vadd.f32 %v729_v48, %v194_v3  ;;  %v320_v9 = vmax.f32 %v295_v5, 0.0  ;;  %v296_v10 = vadd.f32 %v729_v48, %v250_v6 }
 0x127   :  { %331 = vst [vmem:[#allocation5 + $0x30] sm:$0xff] %v306_v8  ;;  %v307_v29 = vmax.f32 %v282_v27, 0.0  ;;  %345 = vst [vmem:[#allocation5 + $0xa0] sm:$0xff] %v320_v9  ;;  %v321_v11 = vmax.f32 %v296_v10, 0.0 }
 0x128   :  { %v198_v12 = vpop.f32.mrb[16].mxu0  ;;  %v254_v13 = vpop.f32.mrb[16].mxu1 }
 0x129   :  { %332 = vst [vmem:[#allocation5 + $0x38] sm:$0xff] %v307_v29  ;;  %v199_v28 = vadd.f32 %v198_v12, %v688_v33  ;;  %v431_v14 = vpop.f32.mrb[17].mxu0  ;;  %346 = vst [vmem:[#allocation5 + $0xa8] sm:$0xff] %v321_v11  ;;  %v255_v30 = vadd.f32 %v254_v13, %v696_v35  ;;  %v459_v19 = vpop.f32.mrb[17].mxu1 }
 0x12a   :  { %v201_v20 = vpop.f32.mrb[18].mxu0  ;;  %v257_v25 = vpop.f32.mrb[18].mxu1 }
 0x12b   :  { %v283_v26 = vadd.f32 %v729_v48, %v199_v28  ;;  %v202_v15 = vadd.f32 %v201_v20, %v692_v34  ;;  %v432_v31 = vpop.f32.mrb[19].mxu0  ;;  %v297_v32 = vadd.f32 %v729_v48, %v255_v30  ;;  %v258_v17 = vadd.f32 %v257_v25, %v698_v36  ;;  %v460_v37 = vpop.f32.mrb[19].mxu1 }
 0x12d   :  { %v308_v38 = vmax.f32 %v283_v26, 0.0  ;;  %v284_v33 = vadd.f32 %v729_v48, %v202_v15  ;;  %v322_v42 = vmax.f32 %v297_v32, 0.0  ;;  %v298_v16 = vadd.f32 %v729_v48, %v258_v17 }
 0x12f   :  { %333 = vst [vmem:[#allocation5 + $0x40] sm:$0xff] %v308_v38  ;;  %v309_v35 = vmax.f32 %v284_v33, 0.0  ;;  %347 = vst [vmem:[#allocation5 + $0xb0] sm:$0xff] %v322_v42  ;;  %v323_v43 = vmax.f32 %v298_v16, 0.0 }
 0x130   :  { %v206_v18 = vpop.f32.mrb[20].mxu0  ;;  %v262_v46 = vpop.f32.mrb[20].mxu1 }
 0x131   :  { %334 = vst [vmem:[#allocation5 + $0x48] sm:$0xff] %v309_v35  ;;  %v207_v34 = vadd.f32 %v206_v18, %v706_v39  ;;  %v435_v47 = vpop.f32.mrb[21].mxu0  ;;  %348 = vst [vmem:[#allocation5 + $0xb8] sm:$0xff] %v323_v43  ;;  %v263_v36 = vadd.f32 %v262_v46, %v712_v41  ;;  %v463_v49 = vpop.f32.mrb[21].mxu1 }
 0x132   :  { %v209_v50 = vpop.f32.mrb[22].mxu0  ;;  %v265_v51 = vpop.f32.mrb[22].mxu1 }
 0x133   :  { %v285_v52 = vadd.f32 %v729_v48, %v207_v34  ;;  %v210_v53 = vadd.f32 %v209_v50, %v708_v40  ;;  %v436_v54 = vpop.f32.mrb[23].mxu0  ;;  %v299_v55 = vadd.f32 %v729_v48, %v263_v36  ;;  %v464_v56 = vpop.f32.mrb[23].mxu1 }
 0x135   :  { %v310_v21 = vmax.f32 %v285_v52, 0.0  ;;  %v286_v57 = vadd.f32 %v729_v48, %v210_v53  ;;  %v324_v58 = vmax.f32 %v299_v55, 0.0 }
 0x137   :  { %335 = vst [vmem:[#allocation5 + $0x50] sm:$0xff] %v310_v21  ;;  %v311_v39 = vmax.f32 %v286_v57, 0.0  ;;  %349 = vst [vmem:[#allocation5 + $0xc0] sm:$0xff] %v324_v58 }
 0x138   :  { %v214_v23 = vpop.f32.mrb[24].mxu0 }
 0x139   :  { %336 = vst [vmem:[#allocation5 + $0x58] sm:$0xff] %v311_v39  ;;  %v215_v41 = vadd.f32 %v214_v23, %v720_v44  ;;  %v439_v59 = vpop.f32.mrb[25].mxu0 }
 0x13a   :  { %v217_v60 = vpop.f32.mrb[26].mxu0 }
 0x13b   :  { %v287_v61 = vadd.f32 %v729_v48, %v215_v41  ;;  %v218_v40 = vadd.f32 %v217_v60, %v722_v45  ;;  %v440_v22 = vpop.f32.mrb[27].mxu0 }
 0x13d   :  { %v312_v62 = vmax.f32 %v287_v61, 0.0  ;;  %v288_v24 = vadd.f32 %v729_v48, %v218_v40 }
 0x13f   :  { %337 = vst [vmem:[#allocation5 + $0x60] sm:$0xff] %v312_v62  ;;  %v313_v63 = vmax.f32 %v288_v24, 0.0 }
 0x141   :  { %338 = vst [vmem:[#allocation5 + $0x68] sm:$0xff] %v313_v63 }
 0x142   :  { %528 = shalt.err (!%p525_p12)
}
 0x143   :  { %s529_s19 = scalar_lea.hbm %s799_s3, 3200 }
 0x144   :  { %p530_p13 = scmp.ne.s32.totalorder %s799_s3, %s529_s19  ;;  %p533_p0 = scmp.lt.u32.totalorder %s529_s19, %s799_s3 }
 0x146   :  { %p535_p1 = pnand %p533_p0, %p530_p13 }
 0x148   :  { %538 = shalt.err (!%p535_p1)
}
 0x149   :  { %361 = dma.vmem_to_hbm [thread:$0]  %s356_s15, 3200, %s799_s3, [#allocation4], %s544_s22, %s544_s22, %s545_s23  }
 0x14a   :  { %541 = dma.done.wait [#allocation4], 3200  }
 0x14b   :  { %542 = vsyncadd [#allocation4], 4294964096 }
 0x14c   :  { %365 = vsyncpa [#allocation3], 1 }
 0x14d   :  { %366 = vsyncpa [#allocation4], 1 }

</bundles_post_ra>
